<compile_context>
chip_gen: v7x
topology: tpu7x:2x2x1
jax: 0.10.0
libtpu: 0.0.40
codegen_flags: <defaults>
</compile_context>

<pallas_src>
import functools

import jax
import jax.numpy as jnp
from jax import lax
from jax.experimental import pallas as pl
from jax.experimental.pallas import tpu as pltpu


def birnn_kernel(x_ref, w_ref, out_ref, *, S, B, I, H, O, IP):
    """x_ref: (S*B, I) f32,  w_ref: (IP + 4H + 2, 2H) packed f32,
    out_ref: (B, O) f32.  Row layout of w_ref:
      [0, I)           : [Wih_f | Wih_b]            (x @ W form)
      [IP, IP+2H)      : blockdiag(Whh_f, Whh_b)
      [IP+2H, IP+4H)   : [Wfc | 0]  (lane-padded to 2H)
      IP+4H            : [b_ih_f+b_hh_f | b_ih_b+b_hh_b]
      IP+4H+1          : [b_fc | 0]
    """
    H2 = 2 * H
    r_whh = IP
    r_wfc = IP + H2
    r_bias = IP + 2 * H2

    x = x_ref[...]                                    # (S*B, I)
    wih = w_ref[0:I, :]                               # (I, 2H)
    whh = w_ref[r_whh:r_whh + H2, :]                  # (2H, 2H)
    wfc = w_ref[r_wfc:r_wfc + H2, :]                  # (2H, 2H)
    b_cat = w_ref[r_bias:r_bias + 1, :]               # (1, 2H)
    b_fc = w_ref[r_bias + 1:r_bias + 2, :]            # (1, 2H)

    # --- one MXU pass: input projections, both directions, all timesteps ---
    # (dense weight, biases folded once; entirely off the recurrence chain)
    xp = jnp.dot(x, wih, preferred_element_type=jnp.float32) + b_cat  # (S*B, 2H)

    # Lane mask: lanes [0,H) = forward half, [H,2H) = backward half.
    # Hoisted out of the loop (JAX does not CSE broadcasts).
    fwd_lane = lax.broadcasted_iota(jnp.int32, (B, H2), dimension=1) < H

    # --- fused fwd/bwd recurrence: 1 dot + 1 select + 1 tanh per step -------
    # The select builds [xp_f[t] | xp_b[S-1-t]] from static slices of xp and
    # does not depend on h, so it stays off the serial critical path.
    h = jnp.zeros((B, H2), dtype=jnp.float32)         # [h_fwd | h_bwd]
    for t in range(S):                                # S static -> unrolled
        xa = jnp.where(fwd_lane,
                       xp[t * B:(t + 1) * B, :],
                       xp[(S - 1 - t) * B:(S - t) * B, :])
        h = jnp.tanh(jnp.dot(h, whh, preferred_element_type=jnp.float32) + xa)

    # --- FC head on [h_fwd | h_bwd]; weight lane-padded, keep first O lanes --
    y = jnp.dot(h, wfc, preferred_element_type=jnp.float32) + b_fc
    out_ref[...] = y[:, :O]


def init_params(key, input_size, hidden_size, output_size):
    """Deterministic uniform(-1/sqrt(H), 1/sqrt(H)) init, PyTorch-style."""
    H, I, O = hidden_size, input_size, output_size
    k = 1.0 / jnp.sqrt(jnp.float32(H))
    keys = jax.random.split(key, 12)
    u = lambda kk, shape: jax.random.uniform(kk, shape, jnp.float32, -k, k)

    params = {
        # forward direction (already transposed to x @ W form)
        "wih_f": u(keys[0], (I, H)),
        "whh_f": u(keys[1], (H, H)),
        "b_f":   (u(keys[2], (1, H)) + u(keys[3], (1, H))),   # b_ih + b_hh
        # backward direction (separate weight set, as in nn.RNN bidirectional)
        "wih_b": u(keys[4], (I, H)),
        "whh_b": u(keys[5], (H, H)),
        "b_b":   (u(keys[6], (1, H)) + u(keys[7], (1, H))),
    }
    kfc = 1.0 / jnp.sqrt(jnp.float32(2 * H))
    wfc = jax.random.uniform(keys[8], (2 * H, O), jnp.float32, -kfc, kfc)
    params["wfc_f"] = wfc[:H]
    params["wfc_b"] = wfc[H:]
    params["bfc"] = jax.random.uniform(keys[9], (1, O), jnp.float32, -kfc, kfc)
    return params


def prepare_params(params):
    """ONE-TIME packing of all weight-derived operands into a single padded
    buffer (hoisted out of the forward path; depends only on params)."""
    I, H = params["wih_f"].shape
    O = params["bfc"].shape[-1]
    H2 = 2 * H
    assert O <= H2, "FC output wider than 2*hidden not supported by packing"
    IP = ((I + 7) // 8) * 8      # sublane-align the Whh / Wfc blocks

    wih_cat = jnp.concatenate([params["wih_f"], params["wih_b"]], axis=1)  # (I,2H)
    wih_cat = jnp.pad(wih_cat, ((0, IP - I), (0, 0)))                      # (IP,2H)

    z = jnp.zeros((H, H), jnp.float32)
    whh_blk = jnp.block([[params["whh_f"], z],
                         [z, params["whh_b"]]])                            # (2H,2H)

    wfc = jnp.concatenate([params["wfc_f"], params["wfc_b"]], axis=0)      # (2H,O)
    wfc_pad = jnp.pad(wfc, ((0, 0), (0, H2 - O)))                          # (2H,2H)

    b_cat = jnp.concatenate([params["b_f"], params["b_b"]], axis=1)        # (1,2H)
    bfc_pad = jnp.pad(params["bfc"], ((0, 0), (0, H2 - O)))                # (1,2H)

    wpack = jnp.concatenate([wih_cat, whh_blk, wfc_pad, b_cat, bfc_pad],
                            axis=0).astype(jnp.float32)                   # (IP+4H+2, 2H)
    meta = dict(I=int(I), H=int(H), O=int(O), IP=int(IP))
    return wpack, meta


@functools.partial(jax.jit, static_argnames=("H", "O", "IP"))
def birnn_forward(input_robot, wpack, *, H, O, IP):
    # input_robot: (S, I, B) -> permute(0,2,1) -> (S, B, I) -> flatten (S*B, I)
    # so the kernel needs no in-kernel reshape (layout glue stays in XLA).
    S, I, B = input_robot.shape
    x = jnp.transpose(input_robot, (0, 2, 1)).astype(jnp.float32)
    x_flat = x.reshape(S * B, I)

    kernel = functools.partial(birnn_kernel, S=S, B=B, I=I, H=H, O=O, IP=IP)
    vmem = pl.BlockSpec(memory_space=pltpu.MemorySpace.VMEM)
    return pl.pallas_call(
        kernel,
        out_shape=jax.ShapeDtypeStruct((B, O), jnp.float32),
        in_specs=[vmem, vmem],
        out_specs=vmem,
    )(x_flat, wpack)


def birnn_reference(input_robot, params):
    """Pure-JAX reference of the same math (sanity check)."""
    x = jnp.transpose(input_robot, (0, 2, 1)).astype(jnp.float32)  # (S, B, I)
    B = x.shape[1]
    H = params["whh_f"].shape[0]

    def step(w_ih, w_hh, b):
        def f(h, x_t):
            h_new = jnp.tanh(x_t @ w_ih + h @ w_hh + b)
            return h_new, None
        return f

    h0 = jnp.zeros((B, H), jnp.float32)
    h_fwd, _ = lax.scan(step(params["wih_f"], params["whh_f"], params["b_f"]), h0, x)
    h_bwd, _ = lax.scan(step(params["wih_b"], params["whh_b"], params["b_b"]), h0, x[::-1])
    return h_fwd @ params["wfc_f"] + h_bwd @ params["wfc_b"] + params["bfc"]


if __name__ == "__main__":
    # Small shapes consistent with the module's forward:
    #   input_robot: (seq=16, input_size=8, batch=4), hidden=32, output=8
    S, I, B, H, O = 16, 8, 4, 32, 8

    key = jax.random.PRNGKey(0)
    k_in, k_par = jax.random.split(key)
    input_robot = jax.random.normal(k_in, (S, I, B), jnp.float32)
    params = init_params(k_par, I, H, O)

    # One-time weight packing (hoisted out of the forward path).
    wpack, meta = prepare_params(params)

    out = birnn_forward(input_robot, wpack,
                        H=meta["H"], O=meta["O"], IP=meta["IP"])
    out = jax.block_until_ready(out)

    ref = birnn_reference(input_robot, params)
    assert out.shape == (B, O), out.shape
    assert jnp.allclose(out, ref, atol=1e-3, rtol=1e-3), (
        float(jnp.max(jnp.abs(out - ref))))

    print("KERNEL_OK")
</pallas_src>

<mosaic_0001>
module attributes {stable_mosaic.version = 11 : i64} {
  func.func @birnn_kernel(%arg0: memref<64x8xf32, #tpu.memory_space<vmem>>, %arg1: memref<138x64xf32, #tpu.memory_space<vmem>>, %arg2: memref<4x8xf32, #tpu.memory_space<vmem>>) attributes {dimension_semantics = [], scalar_prefetch = 0 : i64, scratch_operands = 0 : i64, tpu.core_type = #tpu.core_type<tc>} {
    %c0 = arith.constant 0 : index
    %c0_0 = arith.constant 0 : index
    %0 = vector.load %arg0[%c0, %c0_0] : memref<64x8xf32, #tpu.memory_space<vmem>>, vector<64x8xf32>
    %c0_1 = arith.constant 0 : index
    %c0_2 = arith.constant 0 : index
    %1 = vector.load %arg1[%c0_1, %c0_2] : memref<138x64xf32, #tpu.memory_space<vmem>>, vector<8x64xf32>
    %c8 = arith.constant 8 : index
    %c0_3 = arith.constant 0 : index
    %2 = vector.load %arg1[%c8, %c0_3] : memref<138x64xf32, #tpu.memory_space<vmem>>, vector<64x64xf32>
    %c72 = arith.constant 72 : index
    %c0_4 = arith.constant 0 : index
    %3 = vector.load %arg1[%c72, %c0_4] : memref<138x64xf32, #tpu.memory_space<vmem>>, vector<64x64xf32>
    %c136 = arith.constant 136 : index
    %c0_5 = arith.constant 0 : index
    %4 = vector.load %arg1[%c136, %c0_5] : memref<138x64xf32, #tpu.memory_space<vmem>>, vector<1x64xf32>
    %c137 = arith.constant 137 : index
    %c0_6 = arith.constant 0 : index
    %5 = vector.load %arg1[%c137, %c0_6] : memref<138x64xf32, #tpu.memory_space<vmem>>, vector<1x64xf32>
    %cst = arith.constant dense<0.000000e+00> : vector<64x64xf32>
    %6 = tpu.matmul %0, %1, %cst {dimension_numbers = #tpu.dot_dimension_numbers<[1], [0], [0], [1], [0, 0, 1, 1], [], []>} : vector<64x8xf32>, vector<8x64xf32>, vector<64x64xf32> -> vector<64x64xf32>
    %7 = vector.broadcast %4 : vector<1x64xf32> to vector<64x64xf32>
    %8 = arith.addf %6, %7 : vector<64x64xf32>
    %9 = tpu.iota {dimensions = array<i32: 1>} : vector<4x64xi32>
    %c32_i32 = arith.constant 32 : i32
    %10 = vector.broadcast %c32_i32 : i32 to vector<4x64xi32>
    %11 = arith.cmpi slt, %9, %10 : vector<4x64xi32>
    %cst_7 = arith.constant 0.000000e+00 : f32
    %12 = vector.broadcast %cst_7 : f32 to vector<4x64xf32>
    %13 = vector.extract_strided_slice %8 {offsets = [0, 0], sizes = [4, 64], strides = [1, 1]} : vector<64x64xf32> to vector<4x64xf32>
    %14 = vector.extract_strided_slice %8 {offsets = [60, 0], sizes = [4, 64], strides = [1, 1]} : vector<64x64xf32> to vector<4x64xf32>
    %15 = arith.select %11, %13, %14 : vector<4x64xi1>, vector<4x64xf32>
    %cst_8 = arith.constant dense<0.000000e+00> : vector<4x64xf32>
    %16 = tpu.matmul %12, %2, %cst_8 {dimension_numbers = #tpu.dot_dimension_numbers<[1], [0], [0], [1], [0, 0, 1, 1], [], []>} : vector<4x64xf32>, vector<64x64xf32>, vector<4x64xf32> -> vector<4x64xf32>
    %17 = arith.addf %16, %15 : vector<4x64xf32>
    %18 = math.tanh %17 : vector<4x64xf32>
    %19 = vector.extract_strided_slice %8 {offsets = [4, 0], sizes = [4, 64], strides = [1, 1]} : vector<64x64xf32> to vector<4x64xf32>
    %20 = vector.extract_strided_slice %8 {offsets = [56, 0], sizes = [4, 64], strides = [1, 1]} : vector<64x64xf32> to vector<4x64xf32>
    %21 = arith.select %11, %19, %20 : vector<4x64xi1>, vector<4x64xf32>
    %cst_9 = arith.constant dense<0.000000e+00> : vector<4x64xf32>
    %22 = tpu.matmul %18, %2, %cst_9 {dimension_numbers = #tpu.dot_dimension_numbers<[1], [0], [0], [1], [0, 0, 1, 1], [], []>} : vector<4x64xf32>, vector<64x64xf32>, vector<4x64xf32> -> vector<4x64xf32>
    %23 = arith.addf %22, %21 : vector<4x64xf32>
    %24 = math.tanh %23 : vector<4x64xf32>
    %25 = vector.extract_strided_slice %8 {offsets = [8, 0], sizes = [4, 64], strides = [1, 1]} : vector<64x64xf32> to vector<4x64xf32>
    %26 = vector.extract_strided_slice %8 {offsets = [52, 0], sizes = [4, 64], strides = [1, 1]} : vector<64x64xf32> to vector<4x64xf32>
    %27 = arith.select %11, %25, %26 : vector<4x64xi1>, vector<4x64xf32>
    %cst_10 = arith.constant dense<0.000000e+00> : vector<4x64xf32>
    %28 = tpu.matmul %24, %2, %cst_10 {dimension_numbers = #tpu.dot_dimension_numbers<[1], [0], [0], [1], [0, 0, 1, 1], [], []>} : vector<4x64xf32>, vector<64x64xf32>, vector<4x64xf32> -> vector<4x64xf32>
    %29 = arith.addf %28, %27 : vector<4x64xf32>
    %30 = math.tanh %29 : vector<4x64xf32>
    %31 = vector.extract_strided_slice %8 {offsets = [12, 0], sizes = [4, 64], strides = [1, 1]} : vector<64x64xf32> to vector<4x64xf32>
    %32 = vector.extract_strided_slice %8 {offsets = [48, 0], sizes = [4, 64], strides = [1, 1]} : vector<64x64xf32> to vector<4x64xf32>
    %33 = arith.select %11, %31, %32 : vector<4x64xi1>, vector<4x64xf32>
    %cst_11 = arith.constant dense<0.000000e+00> : vector<4x64xf32>
    %34 = tpu.matmul %30, %2, %cst_11 {dimension_numbers = #tpu.dot_dimension_numbers<[1], [0], [0], [1], [0, 0, 1, 1], [], []>} : vector<4x64xf32>, vector<64x64xf32>, vector<4x64xf32> -> vector<4x64xf32>
    %35 = arith.addf %34, %33 : vector<4x64xf32>
    %36 = math.tanh %35 : vector<4x64xf32>
    %37 = vector.extract_strided_slice %8 {offsets = [16, 0], sizes = [4, 64], strides = [1, 1]} : vector<64x64xf32> to vector<4x64xf32>
    %38 = vector.extract_strided_slice %8 {offsets = [44, 0], sizes = [4, 64], strides = [1, 1]} : vector<64x64xf32> to vector<4x64xf32>
    %39 = arith.select %11, %37, %38 : vector<4x64xi1>, vector<4x64xf32>
    %cst_12 = arith.constant dense<0.000000e+00> : vector<4x64xf32>
    %40 = tpu.matmul %36, %2, %cst_12 {dimension_numbers = #tpu.dot_dimension_numbers<[1], [0], [0], [1], [0, 0, 1, 1], [], []>} : vector<4x64xf32>, vector<64x64xf32>, vector<4x64xf32> -> vector<4x64xf32>
    %41 = arith.addf %40, %39 : vector<4x64xf32>
    %42 = math.tanh %41 : vector<4x64xf32>
    %43 = vector.extract_strided_slice %8 {offsets = [20, 0], sizes = [4, 64], strides = [1, 1]} : vector<64x64xf32> to vector<4x64xf32>
    %44 = vector.extract_strided_slice %8 {offsets = [40, 0], sizes = [4, 64], strides = [1, 1]} : vector<64x64xf32> to vector<4x64xf32>
    %45 = arith.select %11, %43, %44 : vector<4x64xi1>, vector<4x64xf32>
    %cst_13 = arith.constant dense<0.000000e+00> : vector<4x64xf32>
    %46 = tpu.matmul %42, %2, %cst_13 {dimension_numbers = #tpu.dot_dimension_numbers<[1], [0], [0], [1], [0, 0, 1, 1], [], []>} : vector<4x64xf32>, vector<64x64xf32>, vector<4x64xf32> -> vector<4x64xf32>
    %47 = arith.addf %46, %45 : vector<4x64xf32>
    %48 = math.tanh %47 : vector<4x64xf32>
    %49 = vector.extract_strided_slice %8 {offsets = [24, 0], sizes = [4, 64], strides = [1, 1]} : vector<64x64xf32> to vector<4x64xf32>
    %50 = vector.extract_strided_slice %8 {offsets = [36, 0], sizes = [4, 64], strides = [1, 1]} : vector<64x64xf32> to vector<4x64xf32>
    %51 = arith.select %11, %49, %50 : vector<4x64xi1>, vector<4x64xf32>
    %cst_14 = arith.constant dense<0.000000e+00> : vector<4x64xf32>
    %52 = tpu.matmul %48, %2, %cst_14 {dimension_numbers = #tpu.dot_dimension_numbers<[1], [0], [0], [1], [0, 0, 1, 1], [], []>} : vector<4x64xf32>, vector<64x64xf32>, vector<4x64xf32> -> vector<4x64xf32>
    %53 = arith.addf %52, %51 : vector<4x64xf32>
    %54 = math.tanh %53 : vector<4x64xf32>
    %55 = vector.extract_strided_slice %8 {offsets = [28, 0], sizes = [4, 64], strides = [1, 1]} : vector<64x64xf32> to vector<4x64xf32>
    %56 = vector.extract_strided_slice %8 {offsets = [32, 0], sizes = [4, 64], strides = [1, 1]} : vector<64x64xf32> to vector<4x64xf32>
    %57 = arith.select %11, %55, %56 : vector<4x64xi1>, vector<4x64xf32>
    %cst_15 = arith.constant dense<0.000000e+00> : vector<4x64xf32>
    %58 = tpu.matmul %54, %2, %cst_15 {dimension_numbers = #tpu.dot_dimension_numbers<[1], [0], [0], [1], [0, 0, 1, 1], [], []>} : vector<4x64xf32>, vector<64x64xf32>, vector<4x64xf32> -> vector<4x64xf32>
    %59 = arith.addf %58, %57 : vector<4x64xf32>
    %60 = math.tanh %59 : vector<4x64xf32>
    %61 = vector.extract_strided_slice %8 {offsets = [32, 0], sizes = [4, 64], strides = [1, 1]} : vector<64x64xf32> to vector<4x64xf32>
    %62 = vector.extract_strided_slice %8 {offsets = [28, 0], sizes = [4, 64], strides = [1, 1]} : vector<64x64xf32> to vector<4x64xf32>
    %63 = arith.select %11, %61, %62 : vector<4x64xi1>, vector<4x64xf32>
    %cst_16 = arith.constant dense<0.000000e+00> : vector<4x64xf32>
    %64 = tpu.matmul %60, %2, %cst_16 {dimension_numbers = #tpu.dot_dimension_numbers<[1], [0], [0], [1], [0, 0, 1, 1], [], []>} : vector<4x64xf32>, vector<64x64xf32>, vector<4x64xf32> -> vector<4x64xf32>
    %65 = arith.addf %64, %63 : vector<4x64xf32>
    %66 = math.tanh %65 : vector<4x64xf32>
    %67 = vector.extract_strided_slice %8 {offsets = [36, 0], sizes = [4, 64], strides = [1, 1]} : vector<64x64xf32> to vector<4x64xf32>
    %68 = vector.extract_strided_slice %8 {offsets = [24, 0], sizes = [4, 64], strides = [1, 1]} : vector<64x64xf32> to vector<4x64xf32>
    %69 = arith.select %11, %67, %68 : vector<4x64xi1>, vector<4x64xf32>
    %cst_17 = arith.constant dense<0.000000e+00> : vector<4x64xf32>
    %70 = tpu.matmul %66, %2, %cst_17 {dimension_numbers = #tpu.dot_dimension_numbers<[1], [0], [0], [1], [0, 0, 1, 1], [], []>} : vector<4x64xf32>, vector<64x64xf32>, vector<4x64xf32> -> vector<4x64xf32>
    %71 = arith.addf %70, %69 : vector<4x64xf32>
    %72 = math.tanh %71 : vector<4x64xf32>
    %73 = vector.extract_strided_slice %8 {offsets = [40, 0], sizes = [4, 64], strides = [1, 1]} : vector<64x64xf32> to vector<4x64xf32>
    %74 = vector.extract_strided_slice %8 {offsets = [20, 0], sizes = [4, 64], strides = [1, 1]} : vector<64x64xf32> to vector<4x64xf32>
    %75 = arith.select %11, %73, %74 : vector<4x64xi1>, vector<4x64xf32>
    %cst_18 = arith.constant dense<0.000000e+00> : vector<4x64xf32>
    %76 = tpu.matmul %72, %2, %cst_18 {dimension_numbers = #tpu.dot_dimension_numbers<[1], [0], [0], [1], [0, 0, 1, 1], [], []>} : vector<4x64xf32>, vector<64x64xf32>, vector<4x64xf32> -> vector<4x64xf32>
    %77 = arith.addf %76, %75 : vector<4x64xf32>
    %78 = math.tanh %77 : vector<4x64xf32>
    %79 = vector.extract_strided_slice %8 {offsets = [44, 0], sizes = [4, 64], strides = [1, 1]} : vector<64x64xf32> to vector<4x64xf32>
    %80 = vector.extract_strided_slice %8 {offsets = [16, 0], sizes = [4, 64], strides = [1, 1]} : vector<64x64xf32> to vector<4x64xf32>
    %81 = arith.select %11, %79, %80 : vector<4x64xi1>, vector<4x64xf32>
    %cst_19 = arith.constant dense<0.000000e+00> : vector<4x64xf32>
    %82 = tpu.matmul %78, %2, %cst_19 {dimension_numbers = #tpu.dot_dimension_numbers<[1], [0], [0], [1], [0, 0, 1, 1], [], []>} : vector<4x64xf32>, vector<64x64xf32>, vector<4x64xf32> -> vector<4x64xf32>
    %83 = arith.addf %82, %81 : vector<4x64xf32>
    %84 = math.tanh %83 : vector<4x64xf32>
    %85 = vector.extract_strided_slice %8 {offsets = [48, 0], sizes = [4, 64], strides = [1, 1]} : vector<64x64xf32> to vector<4x64xf32>
    %86 = vector.extract_strided_slice %8 {offsets = [12, 0], sizes = [4, 64], strides = [1, 1]} : vector<64x64xf32> to vector<4x64xf32>
    %87 = arith.select %11, %85, %86 : vector<4x64xi1>, vector<4x64xf32>
    %cst_20 = arith.constant dense<0.000000e+00> : vector<4x64xf32>
    %88 = tpu.matmul %84, %2, %cst_20 {dimension_numbers = #tpu.dot_dimension_numbers<[1], [0], [0], [1], [0, 0, 1, 1], [], []>} : vector<4x64xf32>, vector<64x64xf32>, vector<4x64xf32> -> vector<4x64xf32>
    %89 = arith.addf %88, %87 : vector<4x64xf32>
    %90 = math.tanh %89 : vector<4x64xf32>
    %91 = vector.extract_strided_slice %8 {offsets = [52, 0], sizes = [4, 64], strides = [1, 1]} : vector<64x64xf32> to vector<4x64xf32>
    %92 = vector.extract_strided_slice %8 {offsets = [8, 0], sizes = [4, 64], strides = [1, 1]} : vector<64x64xf32> to vector<4x64xf32>
    %93 = arith.select %11, %91, %92 : vector<4x64xi1>, vector<4x64xf32>
    %cst_21 = arith.constant dense<0.000000e+00> : vector<4x64xf32>
    %94 = tpu.matmul %90, %2, %cst_21 {dimension_numbers = #tpu.dot_dimension_numbers<[1], [0], [0], [1], [0, 0, 1, 1], [], []>} : vector<4x64xf32>, vector<64x64xf32>, vector<4x64xf32> -> vector<4x64xf32>
    %95 = arith.addf %94, %93 : vector<4x64xf32>
    %96 = math.tanh %95 : vector<4x64xf32>
    %97 = vector.extract_strided_slice %8 {offsets = [56, 0], sizes = [4, 64], strides = [1, 1]} : vector<64x64xf32> to vector<4x64xf32>
    %98 = vector.extract_strided_slice %8 {offsets = [4, 0], sizes = [4, 64], strides = [1, 1]} : vector<64x64xf32> to vector<4x64xf32>
    %99 = arith.select %11, %97, %98 : vector<4x64xi1>, vector<4x64xf32>
    %cst_22 = arith.constant dense<0.000000e+00> : vector<4x64xf32>
    %100 = tpu.matmul %96, %2, %cst_22 {dimension_numbers = #tpu.dot_dimension_numbers<[1], [0], [0], [1], [0, 0, 1, 1], [], []>} : vector<4x64xf32>, vector<64x64xf32>, vector<4x64xf32> -> vector<4x64xf32>
    %101 = arith.addf %100, %99 : vector<4x64xf32>
    %102 = math.tanh %101 : vector<4x64xf32>
    %103 = vector.extract_strided_slice %8 {offsets = [60, 0], sizes = [4, 64], strides = [1, 1]} : vector<64x64xf32> to vector<4x64xf32>
    %104 = vector.extract_strided_slice %8 {offsets = [0, 0], sizes = [4, 64], strides = [1, 1]} : vector<64x64xf32> to vector<4x64xf32>
    %105 = arith.select %11, %103, %104 : vector<4x64xi1>, vector<4x64xf32>
    %cst_23 = arith.constant dense<0.000000e+00> : vector<4x64xf32>
    %106 = tpu.matmul %102, %2, %cst_23 {dimension_numbers = #tpu.dot_dimension_numbers<[1], [0], [0], [1], [0, 0, 1, 1], [], []>} : vector<4x64xf32>, vector<64x64xf32>, vector<4x64xf32> -> vector<4x64xf32>
    %107 = arith.addf %106, %105 : vector<4x64xf32>
    %108 = math.tanh %107 : vector<4x64xf32>
    %cst_24 = arith.constant dense<0.000000e+00> : vector<4x64xf32>
    %109 = tpu.matmul %108, %3, %cst_24 {dimension_numbers = #tpu.dot_dimension_numbers<[1], [0], [0], [1], [0, 0, 1, 1], [], []>} : vector<4x64xf32>, vector<64x64xf32>, vector<4x64xf32> -> vector<4x64xf32>
    %110 = vector.broadcast %5 : vector<1x64xf32> to vector<4x64xf32>
    %111 = arith.addf %109, %110 : vector<4x64xf32>
    %112 = vector.extract_strided_slice %111 {offsets = [0, 0], sizes = [4, 8], strides = [1, 1]} : vector<4x64xf32> to vector<4x8xf32>
    %c0_25 = arith.constant 0 : index
    %c0_26 = arith.constant 0 : index
    %113 = vector.load %arg2[%c0_25, %c0_26] : memref<4x8xf32, #tpu.memory_space<vmem>>, vector<4x8xf32>
    tpu.vector_store %arg2[%c0_25, %c0_26], %112 {strides = array<i32>} : memref<4x8xf32, #tpu.memory_space<vmem>>, vector<4x8xf32>,
    return
  }
}

</mosaic_0001>

<bundles_post_ra>
// kernel: birnn_forward.1
= control target key start
LH: loop header
LB: loop body
LE: loop exit
PB: predicated region body
PF: predicated region fallthrough
CT: control target
= control target key end

     0   :  { %vm43_vm0 = vcmask 64512   ;;  %v2299_v6 = vmov 0.0|0.0   ;;  %vm2300_vm1 = vmmov 0   ;;  %v2301_v10 = vmov 0.0   ;;  %s2642_s0 = inlined_call_operand.vmem [shape: f32[64,8], index: 0, kind: input, shape index: {}]   ;;  %s2643_s1 = inlined_call_operand.vmem [shape: f32[138,64], index: 1, kind: input, shape index: {}]   ;;  %s2644_s2 = inlined_call_operand.hbm [shape: f32[4,8], index: 2, kind: output, shape index: {}]  }
   0x1   :  { %v20_v0 = vld [vmem:[%s2643_s1] sm:$0xff]  ;;  %v13_v2 = vld [vmem:[%s2642_s0 + $0x8] sm:$0xff]  ;;  %v22_v4 = vld [vmem:[%s2643_s1 + $0x10] sm:$0xff]  ;;  %2035 = vmatprep.subr.bf16.mxu1 %v2299_v6  ;;  %1728 = vmatprep.mubr.msk.f32.mxu1 %vm2300_vm1, %v2301_v10 }
   0x2   :  { %v12_v1 = vld [vmem:[%s2642_s0] sm:$0xff]  ;;  %1698 = vmatprep.subr.mxu0 %v20_v0  ;;  %v21_v3 = vld [vmem:[%s2643_s1 + $0x8] sm:$0xff]  ;;  %v14_v5 = vld [vmem:[%s2642_s0 + $0x10] sm:$0xff] }
   0x3   :  { %1700 = vmatprep.mubr.msk.f32.mxu0 %vm43_vm0, %v12_v1  ;;  %1699 = vmatpush3.msra.mxu0 %v20_v0  ;;  %v2338_v7 = vpack.c.bf16 %v22_v4, %v21_v3  ;;  %v23_v8 = vld [vmem:[%s2643_s1 + $0x18] sm:$0xff]  ;;  %v24_v9 = vld [vmem:[%s2643_s1 + $0x20] sm:$0xff]  ;;  %v25_v14 = vld [vmem:[%s2643_s1 + $0x28] sm:$0xff] }
   0x4   :  { %1701 = vmatmul.mubr.msk.f32.vlgmr.msra.gmra.mrb[0].mxu0 %vm43_vm0, %v13_v2  ;;  %v15_v11 = vld [vmem:[%s2642_s0 + $0x18] sm:$0xff]  ;;  %v2354_v12 = vpack.c.bf16 %v24_v9, %v23_v8  ;;  %v16_v13 = vld [vmem:[%s2642_s0 + $0x20] sm:$0xff]  ;;  %v26_v15 = vld [vmem:[%s2643_s1 + $0x30] sm:$0xff]  ;;  %2047 = vmatprep.subr.bf16.mxu0 %v2299_v6 }
   0x5   :  { %2037 = vmatpush3.bf16.msra.mxu1 %v2338_v7  ;;  %1703 = vmatprep.mubr.msk.f32.mxu0 %vm43_vm0, %v14_v5 }
   0x6   :  { %2038 = vmatprep.subr.bf16.mxu1 %v2299_v6 }
   0x7   :  { %7 = vsyncpa [#allocation3], 0  ;;  %2049 = vmatpush3.bf16.msra.mxu0 %v2338_v7  ;;  %v17_v16 = vld [vmem:[%s2642_s0 + $0x28] sm:$0xff]  ;;  %v2375_v17 = vpack.c.bf16 %v26_v15, %v25_v14  ;;  %v18_v18 = vld [vmem:[%s2642_s0 + $0x30] sm:$0xff]  ;;  %v173_v25 = vlaneseq  ;;  %vm180_vm3 = vcmask 523264   ;;  %s2302_s6 = smov [#allocation2]  }
   0x8   :  { %1704 = vmatmul.mubr.msk.f32.gmra.mrb[2].mxu0 %vm43_vm0, %v15_v11  ;;  %2050 = vmatprep.subr.bf16.mxu0 %v2299_v6  ;;  %v27_v19 = vld [vmem:[%s2643_s1 + $0x38] sm:$0xff]  ;;  %v28_v20 = vld [vmem:[%s2643_s1 + $0x40] sm:$0xff]  ;;  %v1510_v23 = vld [vmem:[%s2643_s1 + $0x88] ss:$0 sm:$0xff]  ;;  %s1502_s7 = sshll.u32 %s2302_s6, 4  ;;  %vm1494_vm4 = vcmask 60416   ;;  %s1503_s7 = int_to_ptr.vmem [resolvable:$true] %s1502_s7 }
   0x9   :  { %2040 = vmatpush3.bf16.msra.mxu1 %v2354_v12  ;;  %1706 = vmatprep.mubr.msk.f32.mxu0 %vm43_vm0, %v16_v13  ;;  %v19_v21 = vld [vmem:[%s2642_s0 + $0x38] sm:$0xff]  ;;  %v2395_v22 = vpack.c.bf16 %v28_v20, %v27_v19  ;;  %v174_v29 = vand.u32 127, %v173_v25  ;;  %s2275_s8 = scalar_lea.vmem %s1503_s7, 64  ;;  %p2280_p1 = scmp.lt.s32.totalorder %s1503_s7, %s1503_s7 }
   0xa   :  { %2041 = vmatprep.subr.bf16.mxu1 %v2299_v6  ;;  %p2276_p0 = scmp.ne.s32.totalorder %s1503_s7, %s2275_s8  ;;  %p2281_p2 = scmp.lt.s32.totalorder %s2275_s8, %s2275_s8 }
   0xb   :  { %2052 = vmatpush3.bf16.msra.mxu0 %v2354_v12  ;;  %vm175_vm2 = vcmp.lt.s32.totalorder %v174_v29, 32 }
   0xc   :  { %1707 = vmatmul.mubr.msk.f32.gmra.mrb[4].mxu0 %vm43_vm0, %v17_v16  ;;  %2053 = vmatprep.subr.bf16.mxu0 %v2299_v6  ;;  %p2282_p3 = por %p2281_p2, %p2280_p1 }
   0xd   :  { %2043 = vmatpush3.bf16.msra.mxu1 %v2375_v17  ;;  %1709 = vmatprep.mubr.msk.f32.mxu0 %vm43_vm0, %v18_v18 }
   0xe   :  { %2044 = vmatprep.subr.bf16.mxu1 %v2299_v6  ;;  %p2283_p4 = pnand %p2282_p3, %p2276_p0 }
   0xf   :  { %2055 = vmatpush3.bf16.msra.mxu0 %v2375_v17 }
  0x10   :  { %1710 = vmatmul.mubr.msk.f32.gmra.mrb[6].mxu0 %vm43_vm0, %v19_v21  ;;  %2056 = vmatprep.subr.bf16.mxu0 %v2299_v6 }
  0x11   :  { %2046 = vmatpush3.bf16.msra.mxu1 %v2395_v22  ;;  %1747 = vmatprep.mubr.msk.f32.mxu0 %vm2300_vm1, %v2301_v10 }
  0x12   :  { %2059 = vmatprep.subr.bf16.mxu1 %v2299_v6 }
  0x13   :  { %2058 = vmatpush3.bf16.msra.mxu0 %v2395_v22 }
  0x14   :  { %1729 = vmatmul.mubr.f32.vlgmr.msra.gmra.mrb[0].mxu1 %v2301_v10  ;;  %2071 = vmatprep.subr.bf16.mxu0 %v2299_v6 }
  0x15   :  { %2061 = vmatpush3.bf16.msra.mxu1 %v2338_v7  ;;  %1766 = vmatprep.mubr.msk.f32.mxu1 %vm2300_vm1, %v2301_v10 }
  0x16   :  { %2062 = vmatprep.subr.bf16.mxu1 %v2299_v6 }
  0x19   :  { %2064 = vmatpush3.bf16.msra.mxu1 %v2354_v12 }
  0x1a   :  { %2065 = vmatprep.subr.bf16.mxu1 %v2299_v6 }
  0x1d   :  { %2067 = vmatpush3.bf16.msra.mxu1 %v2375_v17 }
  0x1e   :  { %2068 = vmatprep.subr.bf16.mxu1 %v2299_v6 }
  0x21   :  { %2070 = vmatpush3.bf16.msra.mxu1 %v2395_v22 }
  0x22   :  { %2083 = vmatprep.subr.bf16.mxu1 %v2299_v6 }
  0xd7   :  { %v1702_v24 = vpop.f32.mrb[0].mxu0 }
  0xd8   :  { %v140_v26 = vadd.f32 %v1702_v24, %v1510_v23  ;;  %v134_v27 = vpop.f32.mrb[1].mxu0 }
  0xd9   :  { %v135_v35 = vadd.f32 %v1510_v23, %v134_v27 }
  0xda   :  { %v1108_v49 = vrot.slane %v140_v26, 4 }
  0xdb   :  { %v1705_v28 = vpop.f32.mrb[2].mxu0  ;;  %v1263_v45 = vrot.slane %v135_v35, 4 }
  0xdc   :  { %v150_v30 = vadd.f32 %v1705_v28, %v1510_v23  ;;  %v144_v31 = vpop.f32.mrb[3].mxu0 }
  0xdd   :  { %v145_v32 = vadd.f32 %v1510_v23, %v144_v31 }
  0xde   :  { %v798_v38 = vrot.slane %v150_v30, 4 }
  0xdf   :  { %v953_v33 = vrot.slane %v145_v32, 4  ;;  %v1708_v34 = vpop.f32.mrb[4].mxu0 }
  0xe0   :  { %v160_v36 = vadd.f32 %v1708_v34, %v1510_v23  ;;  %v154_v37 = vpop.f32.mrb[5].mxu0 }
  0xe1   :  { %v155_v39 = vadd.f32 %v1510_v23, %v154_v37 }
  0xe2   :  { %v488_v40 = vrot.slane %v160_v36, 4  ;;  %v2422_v41 = vsel %vm175_vm2, %v160_v36, %v953_v33 }
  0xe3   :  { %v643_v42 = vrot.slane %v155_v39, 4  ;;  %v1711_v43 = vpop.f32.mrb[6].mxu0  ;;  %v2425_v44 = vsel %vm175_vm2, %v155_v39, %v798_v38 }
  0xe4   :  { %v170_v46 = vadd.f32 %v1711_v43, %v1510_v23  ;;  %v164_v47 = vpop.f32.mrb[7].mxu0  ;;  %v2428_v48 = vsel %vm175_vm2, %v145_v32, %v488_v40  ;;  %v876_v40 = vrot.slane %v2425_v44, 4 }
  0xe5   :  { %v165_v50 = vadd.f32 %v1510_v23, %v164_v47  ;;  %v2431_v51 = vsel %vm175_vm2, %v150_v30, %v643_v42  ;;  %v566_v21 = vrot.slane %v2428_v48, 4 }
  0xe6   :  { %v177_v52 = vrot.slane %v170_v46, 4  ;;  %v2434_v53 = vsel %vm175_vm2, %v170_v46, %v1263_v45  ;;  %v721_v31 = vrot.slane %v2431_v51, 4 }
  0xe7   :  { %v333_v54 = vrot.slane %v165_v50, 4  ;;  %v250_v55 = vpop.f32.mrb[0].mxu1  ;;  %v2437_v56 = vsel %vm175_vm2, %v165_v50, %v1108_v49  ;;  %v1031_v50 = vrot.slane %v2422_v41, 4 }
  0xe8   :  { %v179_v57 = vsel %vm175_vm2, %v135_v35, %v177_v52  ;;  %v1730_v58 = vpop.f32.mrb[1].mxu1 }
  0xe9   :  { %v251_v59 = vadd.f32 %v250_v55, %v179_v57  ;;  %v335_v60 = vsel %vm175_vm2, %v140_v26, %v333_v54  ;;  %v256_v62 = vrot.slane %v179_v57, 4 }
  0xea   :  { %v411_v9 = vrot.slane %v335_v60, 4 }
  0xeb   :  { %2243 = vtanh.f32 %v251_v59 }
  0xf5   :  { %v2244_v61 = vpop.eup %2243 }
  0xf6   :  { %1748 = vmatmul.mubr.msk.f32.vlgmr.msra.gmra.mrb[8].mxu0 %vm180_vm3, %v2244_v61 }
  0xf7   :  { %2073 = vmatpush3.bf16.msra.mxu0 %v2338_v7  ;;  %1785 = vmatprep.mubr.msk.f32.mxu0 %vm2300_vm1, %v2301_v10 }
  0xf8   :  { %2074 = vmatprep.subr.bf16.mxu0 %v2299_v6 }
  0xfb   :  { %2076 = vmatpush3.bf16.msra.mxu0 %v2354_v12 }
  0xfc   :  { %2077 = vmatprep.subr.bf16.mxu0 %v2299_v6 }
  0xff   :  { %2079 = vmatpush3.bf16.msra.mxu0 %v2375_v17 }
 0x100   :  { %2080 = vmatprep.subr.bf16.mxu0 %v2299_v6 }
 0x103   :  { %2082 = vmatpush3.bf16.msra.mxu0 %v2395_v22 }
 0x104   :  { %2095 = vmatprep.subr.bf16.mxu0 %v2299_v6 }
 0x1c9   :  { %v327_v63 = vpop.f32.mrb[8].mxu0 }
 0x1ca   :  { %v328_v0 = vadd.f32 %v327_v63, %v256_v62  ;;  %v1749_v1 = vpop.f32.mrb[9].mxu0 }
 0x1cc   :  { %2245 = vtanh.f32 %v328_v0 }
 0x1d6   :  { %v2246_v2 = vpop.eup %2245 }
 0x1d7   :  { %1767 = vmatmul.mubr.msk.f32.vlgmr.msra.gmra.mrb[2].mxu1 %vm180_vm3, %v2246_v2 }
 0x1d8   :  { %2085 = vmatpush3.bf16.msra.mxu1 %v2338_v7  ;;  %1804 = vmatprep.mubr.msk.f32.mxu1 %vm2300_vm1, %v2301_v10 }
 0x1d9   :  { %2086 = vmatprep.subr.bf16.mxu1 %v2299_v6 }
 0x1dc   :  { %2088 = vmatpush3.bf16.msra.mxu1 %v2354_v12 }
 0x1dd   :  { %2089 = vmatprep.subr.bf16.mxu1 %v2299_v6 }
 0x1e0   :  { %2091 = vmatpush3.bf16.msra.mxu1 %v2375_v17 }
 0x1e1   :  { %2092 = vmatprep.subr.bf16.mxu1 %v2299_v6 }
 0x1e4   :  { %2094 = vmatpush3.bf16.msra.mxu1 %v2395_v22 }
 0x1e5   :  { %2107 = vmatprep.subr.bf16.mxu1 %v2299_v6 }
 0x2aa   :  { %v405_v3 = vpop.f32.mrb[2].mxu1 }
 0x2ab   :  { %v406_v4 = vadd.f32 %v405_v3, %v335_v60  ;;  %v1768_v5 = vpop.f32.mrb[3].mxu1  ;;  %v1186_v60 = vrot.slane %v2437_v56, 4  ;;  %v32_v3 = vld [vmem:[%s2643_s1 + $0x60] sm:$0xff] }
 0x2ac   :  { %v33_v5 = vld [vmem:[%s2643_s1 + $0x68] sm:$0xff] }
 0x2ad   :  { %2247 = vtanh.f32 %v406_v4 }
 0x2b7   :  { %v2248_v8 = vpop.eup %2247 }
 0x2b8   :  { %1786 = vmatmul.mubr.msk.f32.vlgmr.msra.gmra.mrb[10].mxu0 %vm180_vm3, %v2248_v8  ;;  %v34_v8 = vld [vmem:[%s2643_s1 + $0x70] sm:$0xff] }
 0x2b9   :  { %2097 = vmatpush3.bf16.msra.mxu0 %v2338_v7  ;;  %1823 = vmatprep.mubr.msk.f32.mxu0 %vm2300_vm1, %v2301_v10 }
 0x2ba   :  { %2098 = vmatprep.subr.bf16.mxu0 %v2299_v6 }
 0x2bd   :  { %2100 = vmatpush3.bf16.msra.mxu0 %v2354_v12 }
 0x2be   :  { %2101 = vmatprep.subr.bf16.mxu0 %v2299_v6 }
 0x2c1   :  { %2103 = vmatpush3.bf16.msra.mxu0 %v2375_v17 }
 0x2c2   :  { %2104 = vmatprep.subr.bf16.mxu0 %v2299_v6 }
 0x2c5   :  { %2106 = vmatpush3.bf16.msra.mxu0 %v2395_v22 }
 0x2c6   :  { %2119 = vmatprep.subr.bf16.mxu0 %v2299_v6 }
 0x38b   :  { %v482_v11 = vpop.f32.mrb[10].mxu0 }
 0x38c   :  { %v483_v13 = vadd.f32 %v482_v11, %v411_v9  ;;  %v1787_v14 = vpop.f32.mrb[11].mxu0  ;;  %v2234_v9 = vpack.c.bf16 %v34_v8, %v33_v5  ;;  %v35_v11 = vld [vmem:[%s2643_s1 + $0x78] sm:$0xff] }
 0x38e   :  { %2249 = vtanh.f32 %v483_v13  ;;  %v36_v13 = vld [vmem:[%s2643_s1 + $0x80] sm:$0xff] }
 0x38f   :  { %v2237_v14 = vpack.c.bf16 %v36_v13, %v35_v11 }
 0x398   :  { %v2250_v15 = vpop.eup %2249 }
 0x399   :  { %1805 = vmatmul.mubr.msk.f32.vlgmr.msra.gmra.mrb[4].mxu1 %vm180_vm3, %v2250_v15  ;;  %v1341_v15 = vrot.slane %v2434_v53, 4 }
 0x39a   :  { %2109 = vmatpush3.bf16.msra.mxu1 %v2338_v7  ;;  %1842 = vmatprep.mubr.msk.f32.mxu1 %vm2300_vm1, %v2301_v10 }
 0x39b   :  { %2110 = vmatprep.subr.bf16.mxu1 %v2299_v6 }
 0x39e   :  { %2112 = vmatpush3.bf16.msra.mxu1 %v2354_v12 }
 0x39f   :  { %2113 = vmatprep.subr.bf16.mxu1 %v2299_v6 }
 0x3a2   :  { %2115 = vmatpush3.bf16.msra.mxu1 %v2375_v17 }
 0x3a3   :  { %2116 = vmatprep.subr.bf16.mxu1 %v2299_v6 }
 0x3a6   :  { %2118 = vmatpush3.bf16.msra.mxu1 %v2395_v22 }
 0x3a7   :  { %2131 = vmatprep.subr.bf16.mxu1 %v2299_v6 }
 0x46c   :  { %v560_v16 = vpop.f32.mrb[4].mxu1 }
 0x46d   :  { %v561_v18 = vadd.f32 %v560_v16, %v2428_v48  ;;  %v1806_v19 = vpop.f32.mrb[5].mxu1 }
 0x46f   :  { %2251 = vtanh.f32 %v561_v18 }
 0x479   :  { %v2252_v20 = vpop.eup %2251 }
 0x47a   :  { %1824 = vmatmul.mubr.msk.f32.vlgmr.msra.gmra.mrb[12].mxu0 %vm180_vm3, %v2252_v20 }
 0x47b   :  { %2121 = vmatpush3.bf16.msra.mxu0 %v2338_v7  ;;  %1861 = vmatprep.mubr.msk.f32.mxu0 %vm2300_vm1, %v2301_v10 }
 0x47c   :  { %2122 = vmatprep.subr.bf16.mxu0 %v2299_v6 }
 0x47f   :  { %2124 = vmatpush3.bf16.msra.mxu0 %v2354_v12 }
 0x480   :  { %2125 = vmatprep.subr.bf16.mxu0 %v2299_v6 }
 0x483   :  { %2127 = vmatpush3.bf16.msra.mxu0 %v2375_v17 }
 0x484   :  { %2128 = vmatprep.subr.bf16.mxu0 %v2299_v6 }
 0x487   :  { %2130 = vmatpush3.bf16.msra.mxu0 %v2395_v22 }
 0x488   :  { %2143 = vmatprep.subr.bf16.mxu0 %v2299_v6 }
 0x54d   :  { %v637_v23 = vpop.f32.mrb[12].mxu0 }
 0x54e   :  { %v638_v24 = vadd.f32 %v637_v23, %v566_v21  ;;  %v1825_v25 = vpop.f32.mrb[13].mxu0  ;;  %v1534_v21 = vld [vmem:[%s2643_s1 + $0x89] ss:$0 sm:$0xff] }
 0x550   :  { %2253 = vtanh.f32 %v638_v24 }
 0x55a   :  { %v2254_v26 = vpop.eup %2253 }
 0x55b   :  { %1843 = vmatmul.mubr.msk.f32.vlgmr.msra.gmra.mrb[6].mxu1 %vm180_vm3, %v2254_v26 }
 0x55c   :  { %2133 = vmatpush3.bf16.msra.mxu1 %v2338_v7  ;;  %1880 = vmatprep.mubr.msk.f32.mxu1 %vm2300_vm1, %v2301_v10 }
 0x55d   :  { %2134 = vmatprep.subr.bf16.mxu1 %v2299_v6 }
 0x560   :  { %2136 = vmatpush3.bf16.msra.mxu1 %v2354_v12 }
 0x561   :  { %2137 = vmatprep.subr.bf16.mxu1 %v2299_v6 }
 0x564   :  { %2139 = vmatpush3.bf16.msra.mxu1 %v2375_v17 }
 0x565   :  { %2140 = vmatprep.subr.bf16.mxu1 %v2299_v6 }
 0x568   :  { %2142 = vmatpush3.bf16.msra.mxu1 %v2395_v22 }
 0x569   :  { %2155 = vmatprep.subr.bf16.mxu1 %v2299_v6 }
 0x62e   :  { %v715_v27 = vpop.f32.mrb[6].mxu1 }
 0x62f   :  { %v716_v28 = vadd.f32 %v715_v27, %v2431_v51  ;;  %v1844_v29 = vpop.f32.mrb[7].mxu1 }
 0x631   :  { %2255 = vtanh.f32 %v716_v28 }
 0x63b   :  { %v2256_v30 = vpop.eup %2255 }
 0x63c   :  { %1862 = vmatmul.mubr.msk.f32.vlgmr.msra.gmra.mrb[14].mxu0 %vm180_vm3, %v2256_v30 }
 0x63d   :  { %2145 = vmatpush3.bf16.msra.mxu0 %v2338_v7  ;;  %1899 = vmatprep.mubr.msk.f32.mxu0 %vm2300_vm1, %v2301_v10 }
 0x63e   :  { %2146 = vmatprep.subr.bf16.mxu0 %v2299_v6 }
 0x641   :  { %2148 = vmatpush3.bf16.msra.mxu0 %v2354_v12 }
 0x642   :  { %2149 = vmatprep.subr.bf16.mxu0 %v2299_v6 }
 0x645   :  { %2151 = vmatpush3.bf16.msra.mxu0 %v2375_v17 }
 0x646   :  { %2152 = vmatprep.subr.bf16.mxu0 %v2299_v6 }
 0x649   :  { %2154 = vmatpush3.bf16.msra.mxu0 %v2395_v22 }
 0x64a   :  { %2167 = vmatprep.subr.bf16.mxu0 %v2299_v6 }
 0x70f   :  { %v792_v32 = vpop.f32.mrb[14].mxu0 }
 0x710   :  { %v793_v33 = vadd.f32 %v792_v32, %v721_v31  ;;  %v1863_v34 = vpop.f32.mrb[15].mxu0 }
 0x712   :  { %2257 = vtanh.f32 %v793_v33 }
 0x71c   :  { %v2258_v35 = vpop.eup %2257 }
 0x71d   :  { %1881 = vmatmul.mubr.msk.f32.vlgmr.msra.gmra.mrb[8].mxu1 %vm180_vm3, %v2258_v35 }
 0x71e   :  { %2157 = vmatpush3.bf16.msra.mxu1 %v2338_v7  ;;  %1918 = vmatprep.mubr.msk.f32.mxu1 %vm2300_vm1, %v2301_v10 }
 0x71f   :  { %2158 = vmatprep.subr.bf16.mxu1 %v2299_v6 }
 0x722   :  { %2160 = vmatpush3.bf16.msra.mxu1 %v2354_v12 }
 0x723   :  { %2161 = vmatprep.subr.bf16.mxu1 %v2299_v6 }
 0x726   :  { %2163 = vmatpush3.bf16.msra.mxu1 %v2375_v17 }
 0x727   :  { %2164 = vmatprep.subr.bf16.mxu1 %v2299_v6 }
 0x72a   :  { %2166 = vmatpush3.bf16.msra.mxu1 %v2395_v22 }
 0x72b   :  { %2179 = vmatprep.subr.bf16.mxu1 %v2299_v6 }
 0x7f0   :  { %v870_v36 = vpop.f32.mrb[8].mxu1 }
 0x7f1   :  { %v871_v37 = vadd.f32 %v870_v36, %v2425_v44  ;;  %v1882_v38 = vpop.f32.mrb[9].mxu1 }
 0x7f3   :  { %2259 = vtanh.f32 %v871_v37 }
 0x7fd   :  { %v2260_v39 = vpop.eup %2259 }
 0x7fe   :  { %1900 = vmatmul.mubr.msk.f32.vlgmr.msra.gmra.mrb[16].mxu0 %vm180_vm3, %v2260_v39 }
 0x7ff   :  { %2169 = vmatpush3.bf16.msra.mxu0 %v2338_v7  ;;  %1937 = vmatprep.mubr.msk.f32.mxu0 %vm2300_vm1, %v2301_v10 }
 0x800   :  { %2170 = vmatprep.subr.bf16.mxu0 %v2299_v6 }
 0x803   :  { %2172 = vmatpush3.bf16.msra.mxu0 %v2354_v12 }
 0x804   :  { %2173 = vmatprep.subr.bf16.mxu0 %v2299_v6 }
 0x807   :  { %2175 = vmatpush3.bf16.msra.mxu0 %v2375_v17 }
 0x808   :  { %2176 = vmatprep.subr.bf16.mxu0 %v2299_v6 }
 0x80b   :  { %2178 = vmatpush3.bf16.msra.mxu0 %v2395_v22 }
 0x80c   :  { %2191 = vmatprep.subr.bf16.mxu0 %v2299_v6 }
 0x8d1   :  { %v947_v42 = vpop.f32.mrb[16].mxu0 }
 0x8d2   :  { %v948_v43 = vadd.f32 %v947_v42, %v876_v40  ;;  %v1901_v45 = vpop.f32.mrb[17].mxu0 }
 0x8d4   :  { %2261 = vtanh.f32 %v948_v43 }
 0x8de   :  { %v2262_v46 = vpop.eup %2261 }
 0x8df   :  { %1919 = vmatmul.mubr.msk.f32.vlgmr.msra.gmra.mrb[10].mxu1 %vm180_vm3, %v2262_v46 }
 0x8e0   :  { %2181 = vmatpush3.bf16.msra.mxu1 %v2338_v7  ;;  %1956 = vmatprep.mubr.msk.f32.mxu1 %vm2300_vm1, %v2301_v10 }
 0x8e1   :  { %2182 = vmatprep.subr.bf16.mxu1 %v2299_v6 }
 0x8e4   :  { %2184 = vmatpush3.bf16.msra.mxu1 %v2354_v12 }
 0x8e5   :  { %2185 = vmatprep.subr.bf16.mxu1 %v2299_v6 }
 0x8e8   :  { %2187 = vmatpush3.bf16.msra.mxu1 %v2375_v17 }
 0x8e9   :  { %2188 = vmatprep.subr.bf16.mxu1 %v2299_v6 }
 0x8ec   :  { %2190 = vmatpush3.bf16.msra.mxu1 %v2395_v22 }
 0x8ed   :  { %2203 = vmatprep.subr.bf16.mxu1 %v2299_v6 }
 0x9b2   :  { %v1025_v44 = vpop.f32.mrb[10].mxu1 }
 0x9b3   :  { %v1026_v47 = vadd.f32 %v1025_v44, %v2422_v41  ;;  %v1920_v48 = vpop.f32.mrb[11].mxu1 }
 0x9b5   :  { %2263 = vtanh.f32 %v1026_v47 }
 0x9bf   :  { %v2264_v49 = vpop.eup %2263 }
 0x9c0   :  { %1938 = vmatmul.mubr.msk.f32.vlgmr.msra.gmra.mrb[18].mxu0 %vm180_vm3, %v2264_v49 }
 0x9c1   :  { %2193 = vmatpush3.bf16.msra.mxu0 %v2338_v7  ;;  %1975 = vmatprep.mubr.msk.f32.mxu0 %vm2300_vm1, %v2301_v10 }
 0x9c2   :  { %2194 = vmatprep.subr.bf16.mxu0 %v2299_v6 }
 0x9c5   :  { %2196 = vmatpush3.bf16.msra.mxu0 %v2354_v12 }
 0x9c6   :  { %2197 = vmatprep.subr.bf16.mxu0 %v2299_v6 }
 0x9c9   :  { %2199 = vmatpush3.bf16.msra.mxu0 %v2375_v17 }
 0x9ca   :  { %2200 = vmatprep.subr.bf16.mxu0 %v2299_v6 }
 0x9cd   :  { %2202 = vmatpush3.bf16.msra.mxu0 %v2395_v22 }
 0x9ce   :  { %2215 = vmatprep.subr.bf16.mxu0 %v2299_v6 }
 0xa93   :  { %v1102_v51 = vpop.f32.mrb[18].mxu0 }
 0xa94   :  { %v1103_v52 = vadd.f32 %v1102_v51, %v1031_v50  ;;  %v1939_v54 = vpop.f32.mrb[19].mxu0 }
 0xa96   :  { %2265 = vtanh.f32 %v1103_v52 }
 0xaa0   :  { %v2266_v55 = vpop.eup %2265 }
 0xaa1   :  { %1957 = vmatmul.mubr.msk.f32.vlgmr.msra.gmra.mrb[12].mxu1 %vm180_vm3, %v2266_v55 }
 0xaa2   :  { %2205 = vmatpush3.bf16.msra.mxu1 %v2338_v7  ;;  %1994 = vmatprep.mubr.msk.f32.mxu1 %vm2300_vm1, %v2301_v10 }
 0xaa3   :  { %2206 = vmatprep.subr.bf16.mxu1 %v2299_v6 }
 0xaa6   :  { %2208 = vmatpush3.bf16.msra.mxu1 %v2354_v12 }
 0xaa7   :  { %2209 = vmatprep.subr.bf16.mxu1 %v2299_v6 }
 0xaaa   :  { %2211 = vmatpush3.bf16.msra.mxu1 %v2375_v17 }
 0xaab   :  { %2212 = vmatprep.subr.bf16.mxu1 %v2299_v6 }
 0xaae   :  { %2214 = vmatpush3.bf16.msra.mxu1 %v2395_v22 }
 0xaaf   :  { %2227 = vmatprep.subr.bf16.mxu1 %v2299_v6 }
 0xb74   :  { %v1180_v41 = vpop.f32.mrb[12].mxu1 }
 0xb75   :  { %v1181_v57 = vadd.f32 %v1180_v41, %v2437_v56  ;;  %v1958_v58 = vpop.f32.mrb[13].mxu1 }
 0xb77   :  { %2267 = vtanh.f32 %v1181_v57 }
 0xb81   :  { %v2268_v59 = vpop.eup %2267 }
 0xb82   :  { %1976 = vmatmul.mubr.msk.f32.vlgmr.msra.gmra.mrb[20].mxu0 %vm180_vm3, %v2268_v59 }
 0xb83   :  { %2217 = vmatpush3.bf16.msra.mxu0 %v2338_v7  ;;  %2013 = vmatprep.mubr.msk.f32.mxu0 %vm2300_vm1, %v2301_v10 }
 0xb84   :  { %2218 = vmatprep.subr.bf16.mxu0 %v2299_v6 }
 0xb87   :  { %2220 = vmatpush3.bf16.msra.mxu0 %v2354_v12  ;;  %v29_v12 = vld [vmem:[%s2643_s1 + $0x48] sm:$0xff] }
 0xb88   :  { %2221 = vmatprep.subr.bf16.mxu0 %v2299_v6 }
 0xb8b   :  { %2223 = vmatpush3.bf16.msra.mxu0 %v2375_v17  ;;  %v30_v17 = vld [vmem:[%s2643_s1 + $0x50] sm:$0xff] }
 0xb8c   :  { %2224 = vmatprep.subr.bf16.mxu0 %v2299_v6 }
 0xb8f   :  { %2226 = vmatpush3.bf16.msra.mxu0 %v2395_v22  ;;  %v2228_v22 = vpack.c.bf16 %v30_v17, %v29_v12 }
 0xc55   :  { %v1257_v61 = vpop.f32.mrb[20].mxu0 }
 0xc56   :  { %v1258_v62 = vadd.f32 %v1257_v61, %v1186_v60  ;;  %v1977_v7 = vpop.f32.mrb[21].mxu0 }
 0xc58   :  { %2269 = vtanh.f32 %v1258_v62 }
 0xc62   :  { %v2270_v63 = vpop.eup %2269 }
 0xc63   :  { %1995 = vmatmul.mubr.msk.f32.vlgmr.msra.gmra.mrb[14].mxu1 %vm180_vm3, %v2270_v63 }
 0xc64   :  { %2032 = vmatprep.mubr.msk.f32.mxu1 %vm2300_vm1, %v2301_v10  ;;  %2229 = vmatpush3.bf16.msra.mxu1 %v2228_v22  ;;  %v31_v10 = vld [vmem:[%s2643_s1 + $0x58] sm:$0xff] }
 0xc65   :  { %2230 = vmatprep.subr.bf16.mxu1 %v2299_v6  ;;  %v2231_v4 = vpack.c.bf16 %v32_v3, %v31_v10 }
 0xc68   :  { %2232 = vmatpush3.bf16.msra.mxu1 %v2231_v4 }
 0xc69   :  { %2233 = vmatprep.subr.bf16.mxu1 %v2299_v6 }
 0xc6c   :  { %2235 = vmatpush3.bf16.msra.mxu1 %v2234_v9 }
 0xc6d   :  { %2236 = vmatprep.subr.bf16.mxu1 %v2299_v6 }
 0xc70   :  { %2238 = vmatpush3.bf16.msra.mxu1 %v2237_v14 }
 0xd36   :  { %v1335_v56 = vpop.f32.mrb[14].mxu1 }
 0xd37   :  { %v1336_v0 = vadd.f32 %v1335_v56, %v2434_v53  ;;  %v1996_v1 = vpop.f32.mrb[15].mxu1 }
 0xd39   :  { %2271 = vtanh.f32 %v1336_v0 }
 0xd43   :  { %v2272_v2 = vpop.eup %2271 }
 0xd44   :  { %2014 = vmatmul.mubr.msk.f32.vlgmr.msra.gmra.mrb[22].mxu0 %vm180_vm3, %v2272_v2 }
 0xe17   :  { %v1412_v16 = vpop.f32.mrb[22].mxu0 }
 0xe18   :  { %v1413_v18 = vadd.f32 %v1412_v16, %v1341_v15  ;;  %v2015_v19 = vpop.f32.mrb[23].mxu0 }
 0xe1a   :  { %2273 = vtanh.f32 %v1413_v18 }
 0xe24   :  { %v2274_v20 = vpop.eup %2273 }
 0xe25   :  { %2033 = vmatmul.mubr.msk.f32.vlgmr.msra.gmra.mrb[16].mxu1 %vm180_vm3, %v2274_v20 }
 0xef8   :  { %v1490_v23 = vpop.f32.mrb[16].mxu1 }
 0xef9   :  { %v1491_v24 = vadd.f32 %v1534_v21, %v1490_v23  ;;  %v2034_v6 = vpop.f32.mrb[17].mxu1 }
 0xefb   :  { %1495 = vst.msk [vmem:[#allocation2] sm:$0xf] %vm1494_vm4, %v1491_v24 }
 0xefc   :  { %2286 = shalt.err (!%p2283_p4)
}
 0xefd   :  { %s2287_s11 = scalar_lea.hbm %s2644_s2, 64 }
 0xefe   :  { %p2288_p5 = scmp.ne.s32.totalorder %s2644_s2, %s2287_s11  ;;  %p2291_p6 = scmp.lt.u32.totalorder %s2287_s11, %s2644_s2 }
 0xf00   :  { %p2293_p7 = pnand %p2291_p6, %p2288_p5 }
 0xf02   :  { %2296 = shalt.err (!%p2293_p7)
}
 0xf03   :  { %1505 = dma.vmem_to_hbm [thread:$0]  %s1503_s7, 64, %s2644_s2, [#allocation3]  }
 0xf04   :  { %2297 = dma.done.wait [#allocation3], 64  }
 0xf05   :  { %2298 = vsyncadd [#allocation3], 4294967232 }
 0xf06   :  { %1509 = vsyncpa [#allocation3], 1 }

</bundles_post_ra>
